<compile_context>
chip_gen: v7x
topology: tpu7x:2x2x1
jax: 0.10.0
libtpu: 0.0.40
codegen_flags: <defaults>
</compile_context>

<pallas_src>
import functools

import jax
import jax.numpy as jnp
from jax import lax
from jax.experimental import pallas as pl
from jax.experimental.pallas import tpu as pltpu


def _round_up(a, b):
    return (a + b - 1) // b * b


def _sublane_multiple(dtype):
    return {4: 8, 2: 16, 1: 32}.get(jnp.dtype(dtype).itemsize, 8)


def _pick_block_rows(width, itemsize, nrows, mult,
                     vmem_budget_bytes, target_tile_bytes):
    """Rows per tile.

    The VMEM budget counts the double-buffered input+output tiles plus ~4
    f32-wide temporaries the kernel materializes (x in f32, x-mean, squares,
    epilogue), so large-H tiles stay safe on v7x (64 MiB physical VMEM).  The
    traffic target (~2 MiB of input per grid step) amortizes the ~0.35 us
    per-step overhead; bigger tiles buy only ~1-2%.
    """
    per_row = 4 * width * itemsize + 16 * width
    br = min(vmem_budget_bytes // max(per_row, 1),
             target_tile_bytes // max(width * itemsize, 1),
             4096)
    br = max(mult, (br // mult) * mult)
    cap = _round_up(max(int(nrows), 1), mult)
    br = min(br, cap)
    br = max(mult, (br // mult) * mult)
    return int(br)


def _layernorm_kernel(x_ref, g_ref, b_ref, o_ref, *, eps):
    """Standard path: one LayerNorm row per tile row.  x_ref: (block_rows, H)."""
    x = x_ref[...].astype(jnp.float32)
    inv_h = 1.0 / x.shape[-1]
    mean = jnp.sum(x, axis=-1, keepdims=True) * inv_h
    xc = x - mean
    # Two-pass variance: matches nn.LayerNorm numerics (stable for |mean|>>std).
    var = jnp.sum(xc * xc, axis=-1, keepdims=True) * inv_h
    inv = lax.rsqrt(var + eps)
    o_ref[...] = (xc * (inv * g_ref[...]) + b_ref[...]).astype(o_ref.dtype)


def _layernorm_packed_kernel(x_ref, blk_ref, g_ref, b_ref, o_ref, *, eps, h):
    """Lane-packed path for small H (128 % h == 0): P = 128 // h LayerNorm rows
    share one 128-lane vector, so HBM loads/stores are lane-dense full vregs.

    Per-segment statistics come from the (otherwise idle) MXU: v @ blk, where
    blk is the (128,128) block-diagonal ones matrix, yields each lane's
    segment sum already broadcast across its segment -- no masks, no
    per-segment loop, so the VPU/XLU load stays low enough to sit at the HBM
    roofline on v6e/v7x.  Operands are split into bf16 hi+lo halves so two
    single-pass bf16 matmuls retain ~f32 accuracy.
    """
    x = x_ref[...].astype(jnp.float32)          # (block_rows, 128)
    blk = blk_ref[...]                          # (128, 128) bf16 block-diag ones
    inv_h = 1.0 / h

    def seg_sum(v):
        hi = v.astype(jnp.bfloat16)
        lo = (v - hi.astype(jnp.float32)).astype(jnp.bfloat16)
        return (jnp.dot(hi, blk, preferred_element_type=jnp.float32)
                + jnp.dot(lo, blk, preferred_element_type=jnp.float32))

    mean = seg_sum(x) * inv_h                   # per-lane broadcast segment mean
    xc = x - mean
    var = seg_sum(xc * xc) * inv_h              # two-pass variance
    inv = lax.rsqrt(var + eps)
    o_ref[...] = (xc * (inv * g_ref[...]) + b_ref[...]).astype(o_ref.dtype)


def layernorm_pallas(x, gamma, beta, eps=1e-5, block_rows=None,
                     target_tile_bytes=2 * 1024 * 1024,
                     vmem_budget_bytes=24 * 1024 * 1024):
    """LayerNorm over the last axis of x (PyTorch nn.LayerNorm semantics).

    x: (..., H); gamma, beta: (H,).  The wrapper never pads/copies x: ragged
    row counts are handled by Pallas' partial last block.
    """
    orig_shape = x.shape
    H = int(orig_shape[-1])
    rows = 1
    for d in orig_shape[:-1]:
        rows *= int(d)

    x2 = x.reshape(rows, H)
    itemsize = jnp.dtype(x.dtype).itemsize
    mult = _sublane_multiple(x.dtype)

    # gamma/beta are grid-resident: cast to f32 once here, not per grid step.
    gamma_f = gamma.astype(jnp.float32).reshape(1, H)
    beta_f = beta.astype(jnp.float32).reshape(1, H)

    # Lane-pack P = 128 // H rows per 128-lane vector when H divides 128 and the
    # reshape is free (rows % P == 0 -> contiguous metadata reshape, no copy).
    P = 128 // H if (H < 128 and 128 % H == 0) else 1
    use_packed = P > 1 and rows % P == 0

    if use_packed:
        W = 128
        nrows = rows // P
        xk = x2.reshape(nrows, W)                       # free (contiguous)
        g2 = jnp.tile(gamma_f, (1, P))                  # lane j -> gamma[j % H]
        b2 = jnp.tile(beta_f, (1, P))
        lane = jnp.arange(W, dtype=jnp.int32)
        blk = (lane[:, None] // H == lane[None, :] // H).astype(jnp.bfloat16)
        br = block_rows or _pick_block_rows(W, itemsize, nrows, mult,
                                            vmem_budget_bytes, target_tile_bytes)
        br = max(mult, (br // mult) * mult)
        kernel = functools.partial(_layernorm_packed_kernel, eps=eps, h=H)
        operands = (xk, blk, g2, b2)
        in_specs = [
            pl.BlockSpec((br, W), lambda i: (i, 0)),
            pl.BlockSpec((W, W), lambda i: (0, 0)),     # resident constant
            pl.BlockSpec((1, W), lambda i: (0, 0)),
            pl.BlockSpec((1, W), lambda i: (0, 0)),
        ]
    else:
        # TODO(synk): when H is not a multiple of 128 this path still emits
        # masked partial stores; an in-kernel lane-pad to the next multiple of
        # 128 (ragged lane block + where-mask) would make the stores lane-dense.
        W = H
        nrows = rows
        xk = x2
        g2, b2 = gamma_f, beta_f
        br = block_rows or _pick_block_rows(W, itemsize, nrows, mult,
                                            vmem_budget_bytes, target_tile_bytes)
        br = max(mult, (br // mult) * mult)
        kernel = functools.partial(_layernorm_kernel, eps=eps)
        operands = (xk, g2, b2)
        in_specs = [
            pl.BlockSpec((br, W), lambda i: (i, 0)),
            pl.BlockSpec((1, W), lambda i: (0, 0)),
            pl.BlockSpec((1, W), lambda i: (0, 0)),
        ]

    out = pl.pallas_call(
        kernel,
        out_shape=jax.ShapeDtypeStruct((nrows, W), x.dtype),
        grid=(pl.cdiv(nrows, br),),          # ragged last block -> no row pad
        in_specs=in_specs,
        out_specs=pl.BlockSpec((br, W), lambda i: (i, 0)),
        compiler_params=pltpu.CompilerParams(
            # Single parallel axis: lets megacore chips (v7x, 2 TCs) shard rows.
            dimension_semantics=("parallel",),
            # Explicit: above v5e's 16 MiB scoped default, within v7x's 64 MiB.
            vmem_limit_bytes=32 * 1024 * 1024,
        ),
    )(*operands)

    return out.reshape(orig_shape)


def _ref_layernorm(x, gamma, beta, eps):
    mean = jnp.mean(x, axis=-1, keepdims=True)
    var = jnp.mean((x - mean) ** 2, axis=-1, keepdims=True)
    return (x - mean) * lax.rsqrt(var + eps) * gamma + beta


if __name__ == "__main__":
    # LayerNormModel(normalized_shape=H) applied to (batch=2, seq=8, hidden=32).
    B, S, H = 2, 8, 32
    eps = 1e-5

    key = jax.random.PRNGKey(0)
    kx, kg, kb = jax.random.split(key, 3)
    x = jax.random.normal(kx, (B, S, H), dtype=jnp.float32)
    # nn.LayerNorm defaults are gamma=1, beta=0; perturb deterministically so
    # the elementwise-affine path is actually exercised.
    gamma = jnp.ones((H,), dtype=jnp.float32) + 0.1 * jax.random.normal(kg, (H,))
    beta = 0.1 * jax.random.normal(kb, (H,))

    y = jax.block_until_ready(layernorm_pallas(x, gamma, beta, eps=eps))
    assert y.shape == x.shape and y.dtype == x.dtype
    ref = _ref_layernorm(x, gamma, beta, eps)
    assert jnp.allclose(y, ref, atol=2e-5, rtol=2e-5), "packed path mismatch"

    # Secondary checks: standard path (H multiple of 128) and ragged-row
    # fallback (rows not divisible by the packing factor -> unpacked path).
    for shape in [(2, 8, 128), (3, 5, 32)]:
        h2 = shape[-1]
        k1, k2, k3 = jax.random.split(jax.random.PRNGKey(1), 3)
        x2 = jax.random.normal(k1, shape, dtype=jnp.float32)
        g2 = 1.0 + 0.1 * jax.random.normal(k2, (h2,), dtype=jnp.float32)
        b2 = 0.1 * jax.random.normal(k3, (h2,), dtype=jnp.float32)
        y2 = jax.block_until_ready(layernorm_pallas(x2, g2, b2, eps=eps))
        ref2 = _ref_layernorm(x2, g2, b2, eps)
        assert jnp.allclose(y2, ref2, atol=2e-5, rtol=2e-5), f"mismatch at {shape}"

    print("KERNEL_OK")
</pallas_src>

<mosaic_0001>
module attributes {stable_mosaic.version = 11 : i64} {
  func.func @_layernorm_packed_kernel(%arg0: i32, %arg1: memref<8x128xf32, #tpu.memory_space<vmem>>, %arg2: memref<128x128xbf16, #tpu.memory_space<vmem>>, %arg3: memref<1x128xf32, #tpu.memory_space<vmem>>, %arg4: memref<1x128xf32, #tpu.memory_space<vmem>>, %arg5: memref<8x128xf32, #tpu.memory_space<vmem>>) attributes {dimension_semantics = [#tpu.dimension_semantics<parallel>], iteration_bounds = array<i64: 1>, scalar_prefetch = 0 : i64, scratch_operands = 0 : i64, tpu.core_type = #tpu.core_type<tc>, window_params = [{transform_indices = @transform_0, window_bounds = array<i64: 8, 128>}, {pipeline_mode = #tpu.pipeline_mode<synchronous>, transform_indices = @transform_1, window_bounds = array<i64: 128, 128>}, {pipeline_mode = #tpu.pipeline_mode<synchronous>, transform_indices = @transform_2, window_bounds = array<i64: 1, 128>}, {pipeline_mode = #tpu.pipeline_mode<synchronous>, transform_indices = @transform_3, window_bounds = array<i64: 1, 128>}, {transform_indices = @transform_4, window_bounds = array<i64: 8, 128>}]} {
    %c0 = arith.constant 0 : index
    %c0_0 = arith.constant 0 : index
    %0 = vector.load %arg1[%c0, %c0_0] : memref<8x128xf32, #tpu.memory_space<vmem>>, vector<8x128xf32>
    %c0_1 = arith.constant 0 : index
    %c0_2 = arith.constant 0 : index
    %1 = vector.load %arg2[%c0_1, %c0_2] : memref<128x128xbf16, #tpu.memory_space<vmem>>, vector<128x128xbf16>
    %2 = arith.truncf %0 : vector<8x128xf32> to vector<8x128xbf16>
    %3 = arith.extf %2 : vector<8x128xbf16> to vector<8x128xf32>
    %4 = arith.subf %0, %3 : vector<8x128xf32>
    %5 = arith.truncf %4 : vector<8x128xf32> to vector<8x128xbf16>
    %cst = arith.constant dense<0.000000e+00> : vector<8x128xf32>
    %6 = tpu.matmul %2, %1, %cst {dimension_numbers = #tpu.dot_dimension_numbers<[1], [0], [0], [1], [0, 0, 1, 1], [], []>} : vector<8x128xbf16>, vector<128x128xbf16>, vector<8x128xf32> -> vector<8x128xf32>
    %cst_3 = arith.constant dense<0.000000e+00> : vector<8x128xf32>
    %7 = tpu.matmul %5, %1, %cst_3 {dimension_numbers = #tpu.dot_dimension_numbers<[1], [0], [0], [1], [0, 0, 1, 1], [], []>} : vector<8x128xbf16>, vector<128x128xbf16>, vector<8x128xf32> -> vector<8x128xf32>
    %8 = arith.addf %6, %7 : vector<8x128xf32>
    %cst_4 = arith.constant 3.125000e-02 : f32
    %9 = vector.broadcast %cst_4 : f32 to vector<8x128xf32>
    %10 = arith.mulf %8, %9 : vector<8x128xf32>
    %11 = arith.subf %0, %10 : vector<8x128xf32>
    %12 = arith.mulf %11, %11 : vector<8x128xf32>
    %13 = arith.truncf %12 : vector<8x128xf32> to vector<8x128xbf16>
    %14 = arith.extf %13 : vector<8x128xbf16> to vector<8x128xf32>
    %15 = arith.subf %12, %14 : vector<8x128xf32>
    %16 = arith.truncf %15 : vector<8x128xf32> to vector<8x128xbf16>
    %cst_5 = arith.constant dense<0.000000e+00> : vector<8x128xf32>
    %17 = tpu.matmul %13, %1, %cst_5 {dimension_numbers = #tpu.dot_dimension_numbers<[1], [0], [0], [1], [0, 0, 1, 1], [], []>} : vector<8x128xbf16>, vector<128x128xbf16>, vector<8x128xf32> -> vector<8x128xf32>
    %cst_6 = arith.constant dense<0.000000e+00> : vector<8x128xf32>
    %18 = tpu.matmul %16, %1, %cst_6 {dimension_numbers = #tpu.dot_dimension_numbers<[1], [0], [0], [1], [0, 0, 1, 1], [], []>} : vector<8x128xbf16>, vector<128x128xbf16>, vector<8x128xf32> -> vector<8x128xf32>
    %19 = arith.addf %17, %18 : vector<8x128xf32>
    %cst_7 = arith.constant 3.125000e-02 : f32
    %20 = vector.broadcast %cst_7 : f32 to vector<8x128xf32>
    %21 = arith.mulf %19, %20 : vector<8x128xf32>
    %cst_8 = arith.constant 9.99999974E-6 : f32
    %22 = vector.broadcast %cst_8 : f32 to vector<8x128xf32>
    %23 = arith.addf %21, %22 : vector<8x128xf32>
    %24 = math.rsqrt %23 : vector<8x128xf32>
    %c0_9 = arith.constant 0 : index
    %c0_10 = arith.constant 0 : index
    %25 = vector.load %arg3[%c0_9, %c0_10] : memref<1x128xf32, #tpu.memory_space<vmem>>, vector<1x128xf32>
    %26 = vector.broadcast %25 : vector<1x128xf32> to vector<8x128xf32>
    %27 = arith.mulf %24, %26 : vector<8x128xf32>
    %28 = arith.mulf %11, %27 : vector<8x128xf32>
    %c0_11 = arith.constant 0 : index
    %c0_12 = arith.constant 0 : index
    %29 = vector.load %arg4[%c0_11, %c0_12] : memref<1x128xf32, #tpu.memory_space<vmem>>, vector<1x128xf32>
    %30 = vector.broadcast %29 : vector<1x128xf32> to vector<8x128xf32>
    %31 = arith.addf %28, %30 : vector<8x128xf32>
    %c0_13 = arith.constant 0 : index
    %c0_14 = arith.constant 0 : index
    %32 = vector.load %arg5[%c0_13, %c0_14] : memref<8x128xf32, #tpu.memory_space<vmem>>, vector<8x128xf32>
    tpu.vector_store %arg5[%c0_13, %c0_14], %31 {strides = array<i32>} : memref<8x128xf32, #tpu.memory_space<vmem>>, vector<8x128xf32>,
    return
  }
  func.func @transform_0(%arg0: i32) -> (i32, i32) {
    %c0_i32 = arith.constant 0 : i32
    %c0_i32_0 = arith.constant 0 : i32
    return %arg0, %c0_i32 : i32, i32
  }
  func.func @transform_1(%arg0: i32) -> (i32, i32) {
    %c0_i32 = arith.constant 0 : i32
    %c0_i32_0 = arith.constant 0 : i32
    %c0_i32_1 = arith.constant 0 : i32
    return %c0_i32, %c0_i32_0 : i32, i32
  }
  func.func @transform_2(%arg0: i32) -> (i32, i32) {
    %c0_i32 = arith.constant 0 : i32
    %c0_i32_0 = arith.constant 0 : i32
    %c0_i32_1 = arith.constant 0 : i32
    return %c0_i32, %c0_i32_0 : i32, i32
  }
  func.func @transform_3(%arg0: i32) -> (i32, i32) {
    %c0_i32 = arith.constant 0 : i32
    %c0_i32_0 = arith.constant 0 : i32
    %c0_i32_1 = arith.constant 0 : i32
    return %c0_i32, %c0_i32_0 : i32, i32
  }
  func.func @transform_4(%arg0: i32) -> (i32, i32) {
    %c0_i32 = arith.constant 0 : i32
    %c0_i32_0 = arith.constant 0 : i32
    return %arg0, %c0_i32 : i32, i32
  }
}

</mosaic_0001>

<bundles_post_ra>
// kernel: tpu_custom_call.1
= control target key start
LH: loop header
LB: loop body
LE: loop exit
PB: predicated region body
PF: predicated region fallthrough
CT: control target
= control target key end

     0   :  { %9 = vsyncpa [#allocation3], 0  ;;  %s698_s0 = inlined_call_operand.hbm [shape: f32[4,128], index: 0, kind: input, shape index: {}]   ;;  %s699_s1 = inlined_call_operand.hbm [shape: bf16[128,128], index: 1, kind: input, shape index: {}]   ;;  %s700_s2 = inlined_call_operand.vmem [shape: f32[1,128], index: 2, kind: input, shape index: {}]   ;;  %s701_s3 = inlined_call_operand.vmem [shape: f32[1,128], index: 3, kind: input, shape index: {}]   ;;  %s702_s4 = inlined_call_operand.hbm [shape: f32[4,128], index: 4, kind: output, shape index: {}]  }
   0x1   :  { %10 = vsyncpa [#allocation6], 0 }
   0x2   :  { %11 = vsyncpa [#allocation4], 0 }
   0x3   :  { %16 = vsyncadd [#allocation3], 64  ;;  %s545_s15 = smov [#allocation2]   ;;  %s473_s19 = scalar_lea.hbm %s698_s0, 64 }
   0x4   :  { %s17_s16 = sshll.u32 %s545_s15, 4  ;;  %p474_p0 = scmp.ne.s32.totalorder %s698_s0, %s473_s19  ;;  %s18_s16 = int_to_ptr.vmem [resolvable:$true] %s17_s16 }
   0x5   :  { %p477_p1 = scmp.lt.u32.totalorder %s473_s19, %s698_s0 }
   0x7   :  { %p479_p2 = pnand %p477_p1, %p474_p0 }
   0x9   :  { %482 = shalt.err (!%p479_p2)
}
   0xa   :  { %s483_s24 = scalar_lea.vmem %s18_s16, 64  ;;  %s487_s25 = scalar_lea.vmem %s18_s16, 128 }
   0xb   :  { %p484_p3 = scmp.ne.s32.totalorder %s18_s16, %s483_s24  ;;  %p488_p4 = scmp.lt.s32.totalorder %s18_s16, %s18_s16 }
   0xc   :  { %p489_p5 = scmp.lt.s32.totalorder %s487_s25, %s483_s24 }
   0xe   :  { %p490_p6 = por %p489_p5, %p488_p4 }
  0x10   :  { %p491_p7 = pnand %p490_p6, %p484_p3 }
  0x12   :  { %494 = shalt.err (!%p491_p7)
}
  0x13   :  { %s546_s26 = smov 64   ;;  %s547_s27 = smov 4  }
  0x14   :  { %23 = dma.hbm_to_vmem [thread:$0]  %s698_s0, 64, %s18_s16, [#allocation3], %s546_s26, %s546_s26, %s547_s27  }
  0x15   :  { %s548_s30 = smov [#allocation5]   ;;  %s495_s8 = scalar_lea.hbm %s699_s1, 1024 }
  0x16   :  { %s29_s5 = sshll.u32 %s548_s30, 4  ;;  %p496_p8 = scmp.ne.s32.totalorder %s699_s1, %s495_s8  ;;  %s30_s5 = int_to_ptr.vmem [resolvable:$true] %s29_s5 }
  0x17   :  { %p499_p9 = scmp.lt.u32.totalorder %s495_s8, %s699_s1 }
  0x19   :  { %p501_p10 = pnand %p499_p9, %p496_p8 }
  0x1b   :  { %504 = shalt.err (!%p501_p10)
}
  0x1c   :  { %s505_s13 = scalar_lea.vmem %s30_s5, 1024  ;;  %p510_p12 = scmp.lt.s32.totalorder %s30_s5, %s30_s5 }
  0x1d   :  { %p506_p11 = scmp.ne.s32.totalorder %s30_s5, %s505_s13  ;;  %p511_p13 = scmp.lt.s32.totalorder %s505_s13, %s505_s13 }
  0x1f   :  { %p512_p0 = por %p511_p13, %p510_p12 }
  0x21   :  { %p513_p1 = pnand %p512_p0, %p506_p11 }
  0x23   :  { %516 = shalt.err (!%p513_p1)
}
  0x24   :  { %35 = dma.hbm_to_vmem [thread:$0]  %s699_s1, 1024, %s30_s5, [#allocation6], %s546_s26, %s546_s26, %s547_s27  }
  0x25   :  { %539 = dma.done.wait [#allocation3], 128  }
  0x26   :  { %540 = vsyncadd [#allocation3], 4294967168 }
  0x27   :  { %541 = dma.done.wait [#allocation6], 1024  }
  0x28   :  { %542 = vsyncadd [#allocation6], 4294966272  ;;  %v549_v0 = vmov 0.0   ;;  %vm550_vm0 = vmmov 0   ;;  %v613_v1 = vld [vmem:[#allocation5] sm:$0xff]   ;;  %v616_v2 = vld [vmem:[#allocation5 + $0x8] sm:$0xff]  }
  0x29   :  { %368 = vmatprep.subr.bf16.mxu0 %v549_v0  ;;  %384 = vmatprep.mubr.msk.bf16.mxu0 %vm550_vm0, %v549_v0  ;;  %v622_v3 = vld [vmem:[#allocation5 + $0x10] sm:$0xff]   ;;  %v628_v4 = vld [vmem:[#allocation5 + $0x18] sm:$0xff]   ;;  %v634_v5 = vld [vmem:[#allocation5 + $0x20] sm:$0xff]  }
  0x2a   :  { %408 = vmatprep.subr.bf16.mxu1 %v549_v0  ;;  %424 = vmatprep.mubr.msk.bf16.mxu1 %vm550_vm0, %v549_v0  ;;  %v47_v6 = vld [vmem:[#allocation2] sm:$0xff]  ;;  %v468_v8 = vld [vmem:[#allocation5 + $0x28] sm:$0xff]   ;;  %v469_v10 = vld [vmem:[#allocation5 + $0x30] sm:$0xff]  }
  0x2b   :  { %369 = vmatpush3.bf16.msra.mxu0 %v613_v1  ;;  %409 = vmatpush3.bf16.msra.mxu1 %v613_v1  ;;  %v64_v7 = vpack.c.bf16 %v47_v6, %v47_v6  ;;  %v470_v12 = vld [vmem:[#allocation5 + $0x38] sm:$0xff]  }
  0x2c   :  { %370 = vmatprep.subr.bf16.mxu0 %v549_v0  ;;  %410 = vmatprep.subr.bf16.mxu1 %v549_v0  ;;  %v330_v31 = vld [vmem:[%s700_s2] ss:$0 sm:$0xff] }
  0x2d   :  { %v65_v9 = vunpack.c.l.bf16 %v64_v7  ;;  %v331_v34 = vld [vmem:[%s701_s3] ss:$0 sm:$0xff] }
  0x2f   :  { %371 = vmatpush3.bf16.msra.mxu0 %v616_v2  ;;  %411 = vmatpush3.bf16.msra.mxu1 %v616_v2  ;;  %v66_v11 = vsub.f32 %v47_v6, %v65_v9 }
  0x30   :  { %372 = vmatprep.subr.bf16.mxu0 %v549_v0  ;;  %412 = vmatprep.subr.bf16.mxu1 %v549_v0 }
  0x31   :  { %v67_v13 = vpack.c.bf16 %v66_v11, %v66_v11 }
  0x33   :  { %373 = vmatpush3.bf16.msra.mxu0 %v622_v3  ;;  %413 = vmatpush3.bf16.msra.mxu1 %v622_v3 }
  0x34   :  { %374 = vmatprep.subr.bf16.mxu0 %v549_v0  ;;  %414 = vmatprep.subr.bf16.mxu1 %v549_v0 }
  0x37   :  { %375 = vmatpush3.bf16.msra.mxu0 %v628_v4  ;;  %415 = vmatpush3.bf16.msra.mxu1 %v628_v4 }
  0x38   :  { %376 = vmatprep.subr.bf16.mxu0 %v549_v0  ;;  %416 = vmatprep.subr.bf16.mxu1 %v549_v0 }
  0x3b   :  { %377 = vmatpush3.bf16.msra.mxu0 %v634_v5  ;;  %417 = vmatpush3.bf16.msra.mxu1 %v634_v5 }
  0x3c   :  { %378 = vmatprep.subr.bf16.mxu0 %v549_v0  ;;  %418 = vmatprep.subr.bf16.mxu1 %v549_v0 }
  0x3f   :  { %379 = vmatpush3.bf16.msra.mxu0 %v468_v8  ;;  %419 = vmatpush3.bf16.msra.mxu1 %v468_v8 }
  0x40   :  { %380 = vmatprep.subr.bf16.mxu0 %v549_v0  ;;  %420 = vmatprep.subr.bf16.mxu1 %v549_v0 }
  0x43   :  { %381 = vmatpush3.bf16.msra.mxu0 %v469_v10  ;;  %421 = vmatpush3.bf16.msra.mxu1 %v469_v10 }
  0x44   :  { %382 = vmatprep.subr.bf16.mxu0 %v549_v0  ;;  %422 = vmatprep.subr.bf16.mxu1 %v549_v0 }
  0x47   :  { %383 = vmatpush3.bf16.msra.mxu0 %v470_v12  ;;  %423 = vmatpush3.bf16.msra.mxu1 %v470_v12 }
  0x48   :  { %388 = vmatprep.subr.bf16.mxu0 %v549_v0  ;;  %428 = vmatprep.subr.bf16.mxu1 %v549_v0 }
  0x4a   :  { %385 = vmatmul.mubr.bf16.vlgmr.msra.gmra.mrb[0].mxu0 %v67_v13 }
  0x4b   :  { %389 = vmatpush3.bf16.msra.mxu0 %v613_v1  ;;  %404 = vmatprep.mubr.msk.bf16.mxu0 %vm550_vm0, %v549_v0 }
  0x4c   :  { %390 = vmatprep.subr.bf16.mxu0 %v549_v0 }
  0x4f   :  { %391 = vmatpush3.bf16.msra.mxu0 %v616_v2 }
  0x50   :  { %392 = vmatprep.subr.bf16.mxu0 %v549_v0 }
  0x53   :  { %393 = vmatpush3.bf16.msra.mxu0 %v622_v3 }
  0x54   :  { %394 = vmatprep.subr.bf16.mxu0 %v549_v0 }
  0x57   :  { %395 = vmatpush3.bf16.msra.mxu0 %v628_v4 }
  0x58   :  { %396 = vmatprep.subr.bf16.mxu0 %v549_v0 }
  0x5b   :  { %397 = vmatpush3.bf16.msra.mxu0 %v634_v5 }
  0x5c   :  { %398 = vmatprep.subr.bf16.mxu0 %v549_v0 }
  0x5f   :  { %399 = vmatpush3.bf16.msra.mxu0 %v468_v8 }
  0x60   :  { %400 = vmatprep.subr.bf16.mxu0 %v549_v0 }
  0x63   :  { %401 = vmatpush3.bf16.msra.mxu0 %v469_v10 }
  0x64   :  { %402 = vmatprep.subr.bf16.mxu0 %v549_v0 }
  0x67   :  { %403 = vmatpush3.bf16.msra.mxu0 %v470_v12 }
  0x6a   :  { %405 = vmatmul.mubr.bf16.vlgmr.msra.gmra.mrb[0].mxu0 %v64_v7 }
 0x13d   :  { %v190_v14 = vpop.f32.mrb[0].mxu0 }
 0x13e   :  { %v196_v15 = vmul.f32 0.03125, %v190_v14  ;;  %v406_v16 = vpop.f32.mrb[1].mxu0 }
 0x13f   :  { %v193_v17 = vpop.f32.mrb[2].mxu0 }
 0x140   :  { %v197_v18 = vsub.f32 %v47_v6, %v196_v15  ;;  %v407_v19 = vpop.f32.mrb[3].mxu0 }
 0x142   :  { %v198_v20 = vmul.f32 %v197_v18, %v197_v18 }
 0x144   :  { %v199_v21 = vpack.c.bf16 %v198_v20, %v198_v20 }
 0x146   :  { %v200_v22 = vunpack.c.l.bf16 %v199_v21 }
 0x148   :  { %v201_v23 = vsub.f32 %v198_v20, %v200_v22 }
 0x14a   :  { %v202_v24 = vpack.c.bf16 %v201_v23, %v201_v23 }
 0x14c   :  { %425 = vmatmul.mubr.bf16.vlgmr.msra.gmra.mrb[0].mxu1 %v202_v24 }
 0x14d   :  { %429 = vmatpush3.bf16.msra.mxu1 %v613_v1  ;;  %444 = vmatprep.mubr.msk.bf16.mxu1 %vm550_vm0, %v549_v0 }
 0x14e   :  { %430 = vmatprep.subr.bf16.mxu1 %v549_v0 }
 0x151   :  { %431 = vmatpush3.bf16.msra.mxu1 %v616_v2 }
 0x152   :  { %432 = vmatprep.subr.bf16.mxu1 %v549_v0 }
 0x155   :  { %433 = vmatpush3.bf16.msra.mxu1 %v622_v3 }
 0x156   :  { %434 = vmatprep.subr.bf16.mxu1 %v549_v0 }
 0x159   :  { %435 = vmatpush3.bf16.msra.mxu1 %v628_v4 }
 0x15a   :  { %436 = vmatprep.subr.bf16.mxu1 %v549_v0 }
 0x15d   :  { %437 = vmatpush3.bf16.msra.mxu1 %v634_v5 }
 0x15e   :  { %438 = vmatprep.subr.bf16.mxu1 %v549_v0 }
 0x161   :  { %439 = vmatpush3.bf16.msra.mxu1 %v468_v8 }
 0x162   :  { %440 = vmatprep.subr.bf16.mxu1 %v549_v0 }
 0x165   :  { %441 = vmatpush3.bf16.msra.mxu1 %v469_v10 }
 0x166   :  { %442 = vmatprep.subr.bf16.mxu1 %v549_v0 }
 0x169   :  { %443 = vmatpush3.bf16.msra.mxu1 %v470_v12 }
 0x16c   :  { %445 = vmatmul.mubr.bf16.vlgmr.msra.gmra.mrb[0].mxu1 %v199_v21 }
 0x23f   :  { %v277_v25 = vpop.f32.mrb[0].mxu1 }
 0x240   :  { %v283_v26 = vmul.f32 0.03125, %v277_v25  ;;  %v446_v27 = vpop.f32.mrb[1].mxu1 }
 0x241   :  { %v280_v28 = vpop.f32.mrb[2].mxu1 }
 0x242   :  { %v284_v29 = vadd.f32 1e-05, %v283_v26  ;;  %v447_v30 = vpop.f32.mrb[3].mxu1 }
 0x244   :  { %471 = vrsqrt.f32 %v284_v29 }
 0x24e   :  { %v472_v32 = vpop.eup %471 }
 0x24f   :  { %v293_v33 = vmul.f32 %v472_v32, %v330_v31 }
 0x251   :  { %v294_v35 = vmul.f32 %v293_v33, %v197_v18 }
 0x253   :  { %v302_v36 = vadd.f32 %v331_v34, %v294_v35 }
 0x255   :  { %303 = vst [vmem:[#allocation7] sm:$0xff] %v302_v36 }
 0x256   :  { %308 = vsyncadd [#allocation4], 64  ;;  %s551_s18 = smov [#allocation7]  }
 0x257   :  { %s309_s19 = sshll.u32 %s551_s18, 4  ;;  %s310_s19 = int_to_ptr.vmem [resolvable:$true] %s309_s19 }
 0x258   :  { %s517_s20 = scalar_lea.vmem %s310_s19, 64  ;;  %s521_s21 = scalar_lea.vmem %s310_s19, 128 }
 0x259   :  { %p518_p2 = scmp.ne.s32.totalorder %s310_s19, %s517_s20  ;;  %p522_p3 = scmp.lt.s32.totalorder %s310_s19, %s310_s19 }
 0x25a   :  { %p523_p4 = scmp.lt.s32.totalorder %s521_s21, %s517_s20 }
 0x25c   :  { %p524_p5 = por %p523_p4, %p522_p3 }
 0x25e   :  { %p525_p6 = pnand %p524_p5, %p518_p2 }
 0x260   :  { %528 = shalt.err (!%p525_p6)
}
 0x261   :  { %s529_s23 = scalar_lea.hbm %s702_s4, 64 }
 0x262   :  { %p530_p7 = scmp.ne.s32.totalorder %s702_s4, %s529_s23  ;;  %p533_p8 = scmp.lt.u32.totalorder %s529_s23, %s702_s4 }
 0x264   :  { %p535_p9 = pnand %p533_p8, %p530_p7 }
 0x266   :  { %538 = shalt.err (!%p535_p9)
}
 0x267   :  { %315 = dma.vmem_to_hbm [thread:$0]  %s310_s19, 64, %s702_s4, [#allocation4], %s546_s26, %s546_s26, %s547_s27  }
 0x268   :  { %543 = dma.done.wait [#allocation4], 128  }
 0x269   :  { %544 = vsyncadd [#allocation4], 4294967168 }
 0x26a   :  { %319 = vsyncpa [#allocation3], 1 }
 0x26b   :  { %320 = vsyncpa [#allocation6], 1 }
 0x26c   :  { %321 = vsyncpa [#allocation4], 1 }

</bundles_post_ra>
